<compile_context>
chip_gen: v6e
topology: v6e:2x2x1
jax: 0.10.0
libtpu: 0.0.40
codegen_flags: <defaults>
</compile_context>

<pallas_src>
import jax
import jax.numpy as jnp
from jax.experimental import pallas as pl
from jax.experimental.pallas import tpu as pltpu

Z_DIMS = 32        # vae_pytorch.args.z_dims (synthetic choice)
FC1_SIZE = 180
FC2_SIZE = 180
N_CLASSES = 5
BN_EPS = 1e-5

# Padded (lane/MXU-aligned) dims used inside the kernel
Z_PAD = 128        # 32  -> 128
H_PAD = 256        # 180 -> 256
OUT_PAD = 128      # 5   -> 128


def _round_up(n, m):
    return ((n + m - 1) // m) * m


# ----------------------------------------------------------------------------
# Kernel: pure matmul + bias + ReLU (BN already folded into w2/b2, w3/b3)
# ----------------------------------------------------------------------------
def classifier_kernel(x_ref, w1_ref, b1_ref, w2_ref, b2_ref, w3_ref, b3_ref,
                      out_ref):
    x = x_ref[...]

    h = jnp.dot(x, w1_ref[...], preferred_element_type=jnp.float32) + b1_ref[...]
    h = jnp.maximum(h, 0.0)

    h = jnp.dot(h, w2_ref[...], preferred_element_type=jnp.float32) + b2_ref[...]
    h = jnp.maximum(h, 0.0)

    out = jnp.dot(h, w3_ref[...], preferred_element_type=jnp.float32) + b3_ref[...]
    out_ref[...] = out.astype(out_ref.dtype)


# ----------------------------------------------------------------------------
# Wrapper: fold BN into weights, zero-pad to aligned shapes, tile the batch
# ----------------------------------------------------------------------------
def _fold_and_pad_params(params):
    (w1, b1, g1, beta1, m1, v1,
     w2, b2, g2, beta2, m2, v2,
     w3, b3) = params

    # BN(running stats) applied after ReLU is a fixed per-feature affine:
    #   y = r * scale + shift,  scale = g*rsqrt(v+eps),  shift = beta - m*scale
    # Fold it into the next Linear:  (r*scale+shift)@W + b = r@(scale[:,None]*W) + (shift@W + b)
    scale1 = g1 * jax.lax.rsqrt(v1 + BN_EPS)
    shift1 = beta1 - m1 * scale1
    scale2 = g2 * jax.lax.rsqrt(v2 + BN_EPS)
    shift2 = beta2 - m2 * scale2

    w2f = scale1[:, None] * w2
    b2f = shift1 @ w2 + b2
    w3f = scale2[:, None] * w3
    b3f = shift2 @ w3 + b3

    def pad2(w, rows, cols):
        return jnp.pad(w, ((0, rows - w.shape[0]), (0, cols - w.shape[1])))

    def pad_row(b, cols):
        return jnp.pad(b, (0, cols - b.shape[0])).reshape(1, cols)

    w1p = pad2(w1, Z_PAD, H_PAD)
    b1p = pad_row(b1, H_PAD)
    w2p = pad2(w2f, H_PAD, H_PAD)
    b2p = pad_row(b2f, H_PAD)
    w3p = pad2(w3f, H_PAD, OUT_PAD)
    b3p = pad_row(b3f, OUT_PAD)
    return w1p, b1p, w2p, b2p, w3p, b3p


def classifier_forward(x, params, *, max_batch_tile=512):
    B, Zin = x.shape
    assert Zin == Z_DIMS

    w1p, b1p, w2p, b2p, w3p, b3p = _fold_and_pad_params(params)

    # Pick a large MXU-friendly tile; whole batch in one step when small,
    # >= 2 steps for large batches (so v7x can shard the grid over its 2 TCs).
    tile = min(max_batch_tile, _round_up(B, 8))
    B_pad = _round_up(B, tile)

    # Zero-pad batch (ragged tiles) and feature axis (32 -> 128); padded rows /
    # columns contribute nothing and padded outputs are sliced off below.
    x_pad = jnp.zeros((B_pad, Z_PAD), jnp.float32).at[:B, :Zin].set(
        x.astype(jnp.float32))

    operands = (x_pad, w1p, b1p, w2p, b2p, w3p, b3p)

    x_spec = pl.BlockSpec((tile, Z_PAD), lambda i: (i, 0))
    param_specs = [pl.BlockSpec(op.shape, lambda i: (0, 0)) for op in operands[1:]]
    out_spec = pl.BlockSpec((tile, OUT_PAD), lambda i: (i, 0))

    flops = 2 * B_pad * (Z_PAD * H_PAD + H_PAD * H_PAD + H_PAD * OUT_PAD)
    bytes_accessed = 4 * (x_pad.size + w1p.size + b1p.size + w2p.size
                          + b2p.size + w3p.size + b3p.size + B_pad * OUT_PAD)

    out_full = pl.pallas_call(
        classifier_kernel,
        out_shape=jax.ShapeDtypeStruct((B_pad, OUT_PAD), jnp.float32),
        grid_spec=pltpu.PrefetchScalarGridSpec(
            num_scalar_prefetch=0,
            grid=(B_pad // tile,),
            in_specs=[x_spec] + param_specs,
            out_specs=out_spec,
        ),
        compiler_params=pltpu.CompilerParams(
            dimension_semantics=("parallel",),
        ),
        cost_estimate=pl.CostEstimate(
            flops=flops, transcendentals=0, bytes_accessed=bytes_accessed),
    )(*operands)

    return out_full[:B, :N_CLASSES]


# ----------------------------------------------------------------------------
# Synthetic parameters + pure-JAX reference (unfolded, eval-mode semantics)
# ----------------------------------------------------------------------------
def init_params(key):
    """Deterministic synthetic parameters matching the PyTorch module's shapes."""
    ks = jax.random.split(key, 10)

    def linear(kw, kb, fan_in, fan_out):
        bound = 1.0 / jnp.sqrt(fan_in)
        # stored as [in, out] (pre-transposed from PyTorch's [out, in])
        w = jax.random.uniform(kw, (fan_in, fan_out), jnp.float32, -bound, bound)
        b = jax.random.uniform(kb, (fan_out,), jnp.float32, -bound, bound)
        return w, b

    w1, b1 = linear(ks[0], ks[1], Z_DIMS, FC1_SIZE)
    w2, b2 = linear(ks[2], ks[3], FC1_SIZE, FC2_SIZE)
    w3, b3 = linear(ks[4], ks[5], FC2_SIZE, N_CLASSES)

    g1 = 1.0 + 0.1 * jax.random.normal(ks[6], (FC1_SIZE,), jnp.float32)
    beta1 = 0.1 * jax.random.normal(ks[7], (FC1_SIZE,), jnp.float32)
    m1 = 0.05 * jax.random.normal(ks[8], (FC1_SIZE,), jnp.float32)
    v1 = 1.0 + 0.1 * jax.random.uniform(ks[9], (FC1_SIZE,), jnp.float32)

    ks2 = jax.random.split(ks[9], 4)
    g2 = 1.0 + 0.1 * jax.random.normal(ks2[0], (FC2_SIZE,), jnp.float32)
    beta2 = 0.1 * jax.random.normal(ks2[1], (FC2_SIZE,), jnp.float32)
    m2 = 0.05 * jax.random.normal(ks2[2], (FC2_SIZE,), jnp.float32)
    v2 = 1.0 + 0.1 * jax.random.uniform(ks2[3], (FC2_SIZE,), jnp.float32)

    return (w1, b1, g1, beta1, m1, v1,
            w2, b2, g2, beta2, m2, v2,
            w3, b3)


def classifier_reference(x, params):
    """Pure-JAX reference (eval-mode semantics, BN *not* folded)."""
    (w1, b1, g1, beta1, m1, v1,
     w2, b2, g2, beta2, m2, v2,
     w3, b3) = params
    h = x @ w1 + b1
    h = jnp.maximum(h, 0.0)
    h = (h - m1) / jnp.sqrt(v1 + BN_EPS) * g1 + beta1
    h = h @ w2 + b2
    h = jnp.maximum(h, 0.0)
    h = (h - m2) / jnp.sqrt(v2 + BN_EPS) * g2 + beta2
    return h @ w3 + b3


if __name__ == "__main__":
    key = jax.random.PRNGKey(0)
    kx, kx2, kp = jax.random.split(key, 3)

    params = init_params(kp)

    # Small batch: whole batch in one grid step.
    B = 8
    x = jax.random.normal(kx, (B, Z_DIMS), jnp.float32)
    out = jax.block_until_ready(classifier_forward(x, params))
    ref = classifier_reference(x, params)
    assert out.shape == (B, N_CLASSES)
    assert jnp.allclose(out, ref, atol=1e-4, rtol=1e-4), "mismatch vs JAX reference (B=8)"

    # Ragged batch: exercises zero-padding of the final tile.
    B2 = 37
    x2 = jax.random.normal(kx2, (B2, Z_DIMS), jnp.float32)
    out2 = jax.block_until_ready(classifier_forward(x2, params))
    ref2 = classifier_reference(x2, params)
    assert out2.shape == (B2, N_CLASSES)
    assert jnp.allclose(out2, ref2, atol=1e-4, rtol=1e-4), "mismatch vs JAX reference (B=37)"

    print("KERNEL_OK")
</pallas_src>

<mosaic_0001>
module attributes {stable_mosaic.version = 11 : i64} {
  func.func @classifier_kernel(%arg0: i32, %arg1: memref<8x128xf32, #tpu.memory_space<vmem>>, %arg2: memref<128x256xf32, #tpu.memory_space<vmem>>, %arg3: memref<1x256xf32, #tpu.memory_space<vmem>>, %arg4: memref<256x256xf32, #tpu.memory_space<vmem>>, %arg5: memref<1x256xf32, #tpu.memory_space<vmem>>, %arg6: memref<256x128xf32, #tpu.memory_space<vmem>>, %arg7: memref<1x128xf32, #tpu.memory_space<vmem>>, %arg8: memref<8x128xf32, #tpu.memory_space<vmem>>) attributes {dimension_semantics = [#tpu.dimension_semantics<parallel>], iteration_bounds = array<i64: 1>, scalar_prefetch = 0 : i64, scratch_operands = 0 : i64, tpu.core_type = #tpu.core_type<tc>, window_params = [{transform_indices = @transform_0, window_bounds = array<i64: 8, 128>}, {pipeline_mode = #tpu.pipeline_mode<synchronous>, transform_indices = @transform_1, window_bounds = array<i64: 128, 256>}, {pipeline_mode = #tpu.pipeline_mode<synchronous>, transform_indices = @transform_2, window_bounds = array<i64: 1, 256>}, {pipeline_mode = #tpu.pipeline_mode<synchronous>, transform_indices = @transform_3, window_bounds = array<i64: 256, 256>}, {pipeline_mode = #tpu.pipeline_mode<synchronous>, transform_indices = @transform_4, window_bounds = array<i64: 1, 256>}, {pipeline_mode = #tpu.pipeline_mode<synchronous>, transform_indices = @transform_5, window_bounds = array<i64: 256, 128>}, {pipeline_mode = #tpu.pipeline_mode<synchronous>, transform_indices = @transform_6, window_bounds = array<i64: 1, 128>}, {transform_indices = @transform_7, window_bounds = array<i64: 8, 128>}]} {
    %c0 = arith.constant 0 : index
    %c0_0 = arith.constant 0 : index
    %0 = vector.load %arg1[%c0, %c0_0] : memref<8x128xf32, #tpu.memory_space<vmem>>, vector<8x128xf32>
    %c0_1 = arith.constant 0 : index
    %c0_2 = arith.constant 0 : index
    %1 = vector.load %arg2[%c0_1, %c0_2] : memref<128x256xf32, #tpu.memory_space<vmem>>, vector<128x256xf32>
    %cst = arith.constant dense<0.000000e+00> : vector<8x256xf32>
    %2 = tpu.matmul %0, %1, %cst {dimension_numbers = #tpu.dot_dimension_numbers<[1], [0], [0], [1], [0, 0, 1, 1], [], []>} : vector<8x128xf32>, vector<128x256xf32>, vector<8x256xf32> -> vector<8x256xf32>
    %c0_3 = arith.constant 0 : index
    %c0_4 = arith.constant 0 : index
    %3 = vector.load %arg3[%c0_3, %c0_4] : memref<1x256xf32, #tpu.memory_space<vmem>>, vector<1x256xf32>
    %4 = vector.broadcast %3 : vector<1x256xf32> to vector<8x256xf32>
    %5 = arith.addf %2, %4 : vector<8x256xf32>
    %cst_5 = arith.constant 0.000000e+00 : f32
    %6 = vector.broadcast %cst_5 : f32 to vector<8x256xf32>
    %7 = arith.maximumf %5, %6 : vector<8x256xf32>
    %c0_6 = arith.constant 0 : index
    %c0_7 = arith.constant 0 : index
    %8 = vector.load %arg4[%c0_6, %c0_7] : memref<256x256xf32, #tpu.memory_space<vmem>>, vector<256x256xf32>
    %cst_8 = arith.constant dense<0.000000e+00> : vector<8x256xf32>
    %9 = tpu.matmul %7, %8, %cst_8 {dimension_numbers = #tpu.dot_dimension_numbers<[1], [0], [0], [1], [0, 0, 1, 1], [], []>} : vector<8x256xf32>, vector<256x256xf32>, vector<8x256xf32> -> vector<8x256xf32>
    %c0_9 = arith.constant 0 : index
    %c0_10 = arith.constant 0 : index
    %10 = vector.load %arg5[%c0_9, %c0_10] : memref<1x256xf32, #tpu.memory_space<vmem>>, vector<1x256xf32>
    %11 = vector.broadcast %10 : vector<1x256xf32> to vector<8x256xf32>
    %12 = arith.addf %9, %11 : vector<8x256xf32>
    %cst_11 = arith.constant 0.000000e+00 : f32
    %13 = vector.broadcast %cst_11 : f32 to vector<8x256xf32>
    %14 = arith.maximumf %12, %13 : vector<8x256xf32>
    %c0_12 = arith.constant 0 : index
    %c0_13 = arith.constant 0 : index
    %15 = vector.load %arg6[%c0_12, %c0_13] : memref<256x128xf32, #tpu.memory_space<vmem>>, vector<256x128xf32>
    %cst_14 = arith.constant dense<0.000000e+00> : vector<8x128xf32>
    %16 = tpu.matmul %14, %15, %cst_14 {dimension_numbers = #tpu.dot_dimension_numbers<[1], [0], [0], [1], [0, 0, 1, 1], [], []>} : vector<8x256xf32>, vector<256x128xf32>, vector<8x128xf32> -> vector<8x128xf32>
    %c0_15 = arith.constant 0 : index
    %c0_16 = arith.constant 0 : index
    %17 = vector.load %arg7[%c0_15, %c0_16] : memref<1x128xf32, #tpu.memory_space<vmem>>, vector<1x128xf32>
    %18 = vector.broadcast %17 : vector<1x128xf32> to vector<8x128xf32>
    %19 = arith.addf %16, %18 : vector<8x128xf32>
    %c0_17 = arith.constant 0 : index
    %c0_18 = arith.constant 0 : index
    %20 = vector.load %arg8[%c0_17, %c0_18] : memref<8x128xf32, #tpu.memory_space<vmem>>, vector<8x128xf32>
    tpu.vector_store %arg8[%c0_17, %c0_18], %19 {strides = array<i32>} : memref<8x128xf32, #tpu.memory_space<vmem>>, vector<8x128xf32>,
    return
  }
  func.func @transform_0(%arg0: i32) -> (i32, i32) {
    %c0_i32 = arith.constant 0 : i32
    %c0_i32_0 = arith.constant 0 : i32
    return %arg0, %c0_i32 : i32, i32
  }
  func.func @transform_1(%arg0: i32) -> (i32, i32) {
    %c0_i32 = arith.constant 0 : i32
    %c0_i32_0 = arith.constant 0 : i32
    %c0_i32_1 = arith.constant 0 : i32
    return %c0_i32, %c0_i32_0 : i32, i32
  }
  func.func @transform_2(%arg0: i32) -> (i32, i32) {
    %c0_i32 = arith.constant 0 : i32
    %c0_i32_0 = arith.constant 0 : i32
    %c0_i32_1 = arith.constant 0 : i32
    return %c0_i32, %c0_i32_0 : i32, i32
  }
  func.func @transform_3(%arg0: i32) -> (i32, i32) {
    %c0_i32 = arith.constant 0 : i32
    %c0_i32_0 = arith.constant 0 : i32
    %c0_i32_1 = arith.constant 0 : i32
    return %c0_i32, %c0_i32_0 : i32, i32
  }
  func.func @transform_4(%arg0: i32) -> (i32, i32) {
    %c0_i32 = arith.constant 0 : i32
    %c0_i32_0 = arith.constant 0 : i32
    %c0_i32_1 = arith.constant 0 : i32
    return %c0_i32, %c0_i32_0 : i32, i32
  }
  func.func @transform_5(%arg0: i32) -> (i32, i32) {
    %c0_i32 = arith.constant 0 : i32
    %c0_i32_0 = arith.constant 0 : i32
    %c0_i32_1 = arith.constant 0 : i32
    return %c0_i32, %c0_i32_0 : i32, i32
  }
  func.func @transform_6(%arg0: i32) -> (i32, i32) {
    %c0_i32 = arith.constant 0 : i32
    %c0_i32_0 = arith.constant 0 : i32
    %c0_i32_1 = arith.constant 0 : i32
    return %c0_i32, %c0_i32_0 : i32, i32
  }
  func.func @transform_7(%arg0: i32) -> (i32, i32) {
    %c0_i32 = arith.constant 0 : i32
    %c0_i32_0 = arith.constant 0 : i32
    return %arg0, %c0_i32 : i32, i32
  }
}

</mosaic_0001>

<bundles_post_ra>
// kernel: tpu_custom_call.1
= control target key start
LH: loop header
LB: loop body
LE: loop exit
PB: predicated region body
PF: predicated region fallthrough
CT: control target
= control target key end

     0   :  { %12 = vsyncpa [#allocation3], 0  ;;  %s702_s0 = inlined_call_operand.hbm [shape: f32[8,128], index: 0, kind: input, shape index: {}]   ;;  %s703_s1 = inlined_call_operand.hbm [shape: f32[128,256], index: 1, kind: input, shape index: {}]   ;;  %s704_s2 = inlined_call_operand.vmem [shape: f32[1,256], index: 2, kind: input, shape index: {}]   ;;  %s705_s3 = inlined_call_operand.hbm [shape: f32[256,256], index: 3, kind: input, shape index: {}]   ;;  %s706_s4 = inlined_call_operand.vmem [shape: f32[1,256], index: 4, kind: input, shape index: {}]   ;;  %s707_s5 = inlined_call_operand.hbm [shape: f32[256,128], index: 5, kind: input, shape index: {}]   ;;  %s708_s6 = inlined_call_operand.vmem [shape: f32[1,128], index: 6, kind: input, shape index: {}]   ;;  %s709_s7 = inlined_call_operand.hbm [shape: f32[8,128], index: 7, kind: output, shape index: {}]  }
   0x1   :  { %13 = vsyncpa [#allocation6], 0 }
   0x2   :  { %14 = vsyncpa [#allocation9], 0 }
   0x3   :  { %15 = vsyncpa [#allocation4], 0  ;;  %s628_s24 = smov [#allocation5]  }
   0x4   :  { %s31_s25 = sshll.u32 %s628_s24, 4  ;;  %s32_s25 = int_to_ptr.vmem [resolvable:$true] %s31_s25 }
   0x5   :  { %s528_s26 = scalar_lea.vmem %s32_s25, 4096  ;;  %p533_p1 = scmp.lt.s32.totalorder %s32_s25, %s32_s25 }
   0x6   :  { %p529_p0 = scmp.ne.s32.totalorder %s32_s25, %s528_s26  ;;  %p534_p2 = scmp.lt.s32.totalorder %s528_s26, %s528_s26 }
   0x8   :  { %p535_p3 = por %p534_p2, %p533_p1 }
   0xa   :  { %p536_p4 = pnand %p535_p3, %p529_p0 }
   0xc   :  { %539 = shalt.err (!%p536_p4)
}
   0xd   :  { %s629_s27 = smov 256   ;;  %s630_s28 = smov 16  }
   0xe   :  { %37 = dma.hbm_to_vmem [thread:$0]  %s703_s1, 4096, %s32_s25, [#allocation6], %s629_s27, %s629_s27, %s630_s28  }
   0xf   :  { %s631_s8 = smov [#allocation2]   ;;  %s632_s10 = smov [#allocation7]  }
  0x10   :  { %s22_s9 = sshll.u32 %s631_s8, 4  ;;  %s45_s11 = sshll.u32 %s632_s10, 4  ;;  %s23_s9 = int_to_ptr.vmem [resolvable:$true] %s22_s9  ;;  %s46_s11 = int_to_ptr.vmem [resolvable:$true] %s45_s11 }
  0x11   :  { %s548_s12 = scalar_lea.vmem %s23_s9, 128  ;;  %p553_p6 = scmp.lt.s32.totalorder %s23_s9, %s23_s9 }
  0x12   :  { %p549_p5 = scmp.ne.s32.totalorder %s23_s9, %s548_s12  ;;  %p554_p7 = scmp.lt.s32.totalorder %s548_s12, %s548_s12 }
  0x14   :  { %p555_p8 = por %p554_p7, %p553_p6 }
  0x16   :  { %p556_p9 = pnand %p555_p8, %p549_p5 }
  0x18   :  { %559 = shalt.err (!%p556_p9)
}
  0x19   :  { %25 = dma.hbm_to_vmem [thread:$0]  %s702_s0, 128, %s23_s9, [#allocation3]  }
  0x1a   :  { %s568_s15 = scalar_lea.vmem %s46_s11, 8192  ;;  %p573_p11 = scmp.lt.s32.totalorder %s46_s11, %s46_s11 }
  0x1b   :  { %p569_p10 = scmp.ne.s32.totalorder %s46_s11, %s568_s15  ;;  %p574_p12 = scmp.lt.s32.totalorder %s568_s15, %s568_s15 }
  0x1d   :  { %p575_p13 = por %p574_p12, %p573_p11 }
  0x1f   :  { %p576_p0 = pnand %p575_p13, %p569_p10 }
  0x21   :  { %579 = shalt.err (!%p576_p0)
}
  0x22   :  { %51 = dma.hbm_to_vmem [thread:$0]  %s705_s3, 8192, %s46_s11, [#allocation6], %s629_s27, %s629_s27, %s630_s28  }
  0x23   :  { %s633_s17 = smov [#allocation8]  }
  0x24   :  { %s59_s18 = sshll.u32 %s633_s17, 4  ;;  %s60_s18 = int_to_ptr.vmem [resolvable:$true] %s59_s18 }
  0x25   :  { %s588_s19 = scalar_lea.vmem %s60_s18, 4096  ;;  %p593_p2 = scmp.lt.s32.totalorder %s60_s18, %s60_s18 }
  0x26   :  { %p589_p1 = scmp.ne.s32.totalorder %s60_s18, %s588_s19  ;;  %p594_p3 = scmp.lt.s32.totalorder %s588_s19, %s588_s19 }
  0x28   :  { %p595_p4 = por %p594_p3, %p593_p2 }
  0x2a   :  { %p596_p5 = pnand %p595_p4, %p589_p1 }
  0x2c   :  { %599 = shalt.err (!%p596_p5)
}
  0x2d   :  { %s634_s0 = smov 128   ;;  %s635_s20 = smov 8  }
  0x2e   :  { %65 = dma.hbm_to_vmem [thread:$0]  %s707_s5, 4096, %s60_s18, [#allocation9], %s634_s0, %s634_s0, %s635_s20  }
  0x2f   :  { %620 = dma.done.wait [#allocation3], 128  }
  0x30   :  { %621 = vsyncadd [#allocation3], 4294967168 }
  0x31   :  { %622 = dma.done.wait [#allocation6], 12288  }
  0x32   :  { %623 = vsyncadd [#allocation6], 4294955008 }
  0x33   :  { %624 = dma.done.wait [#allocation9], 4096  }
  0x34   :  { %625 = vsyncadd [#allocation9], 4294963200  ;;  %v636_v0 = vmov 0.0   ;;  %v112_v1 = vld [vmem:[#allocation5 + $0xf8] sm:$0xff]  ;;  %v111_v2 = vld [vmem:[#allocation5 + $0xf0] sm:$0xff]  ;;  %s637_s26 = smov [#allocation10]  }
  0x35   :  { %189 = vmatprep.mubr.f32.mxu0 %v636_v0  ;;  %v110_v3 = vld [vmem:[#allocation5 + $0xe8] sm:$0xff]  ;;  %125 = vmatprep.subr.mxu0 %v112_v1  ;;  %v109_v4 = vld [vmem:[#allocation5 + $0xe0] sm:$0xff]  ;;  %v108_v5 = vld [vmem:[#allocation5 + $0xd8] sm:$0xff]  ;;  %s463_s27 = sshll.u32 %s637_s26, 4  ;;  %s464_s27 = int_to_ptr.vmem [resolvable:$true] %s463_s27 }
  0x36   :  { %126 = vmatpush1.msra.mxu0 %v111_v2  ;;  %v107_v6 = vld [vmem:[#allocation5 + $0xd0] sm:$0xff]  ;;  %v106_v7 = vld [vmem:[#allocation5 + $0xc8] sm:$0xff]  ;;  %v105_v8 = vld [vmem:[#allocation5 + $0xc0] sm:$0xff]  ;;  %p605_p7 = scmp.lt.s32.totalorder %s464_s27, %s464_s27 }
  0x37   :  { %127 = vmatprep.subr.mxu0 %v110_v3  ;;  %v104_v9 = vld [vmem:[#allocation5 + $0xb8] sm:$0xff]  ;;  %v103_v10 = vld [vmem:[#allocation5 + $0xb0] sm:$0xff]  ;;  %v102_v11 = vld [vmem:[#allocation5 + $0xa8] sm:$0xff] }
  0x38   :  { %128 = vmatpush1.msra.mxu0 %v109_v4  ;;  %v101_v12 = vld [vmem:[#allocation5 + $0xa0] sm:$0xff]  ;;  %v100_v13 = vld [vmem:[#allocation5 + $0x98] sm:$0xff]  ;;  %v99_v14 = vld [vmem:[#allocation5 + $0x90] sm:$0xff] }
  0x39   :  { %129 = vmatprep.subr.mxu0 %v108_v5  ;;  %v229_v15 = vld [vmem:[#allocation7 + $0xf8] sm:$0xff]  ;;  %v228_v16 = vld [vmem:[#allocation7 + $0xf0] sm:$0xff]  ;;  %v227_v17 = vld [vmem:[#allocation7 + $0xe8] sm:$0xff] }
  0x3a   :  { %130 = vmatpush1.msra.mxu0 %v107_v6  ;;  %v98_v18 = vld [vmem:[#allocation5 + $0x88] sm:$0xff]  ;;  %274 = vmatprep.subr.mxu1 %v229_v15  ;;  %v226_v19 = vld [vmem:[#allocation7 + $0xe0] sm:$0xff]  ;;  %v225_v21 = vld [vmem:[#allocation7 + $0xd8] sm:$0xff] }
  0x3b   :  { %131 = vmatprep.subr.mxu0 %v106_v7  ;;  %v97_v20 = vld [vmem:[#allocation5 + $0x80] sm:$0xff]  ;;  %275 = vmatpush1.msra.mxu1 %v228_v16  ;;  %v96_v22 = vld [vmem:[#allocation5 + $0x78] sm:$0xff]  ;;  %v224_v23 = vld [vmem:[#allocation7 + $0xd0] sm:$0xff] }
  0x3c   :  { %132 = vmatpush1.msra.mxu0 %v105_v8  ;;  %276 = vmatprep.subr.mxu1 %v227_v17  ;;  %v95_v24 = vld [vmem:[#allocation5 + $0x70] sm:$0xff]  ;;  %v223_v25 = vld [vmem:[#allocation7 + $0xc8] sm:$0xff]  ;;  %v222_v27 = vld [vmem:[#allocation7 + $0xc0] sm:$0xff] }
  0x3d   :  { %133 = vmatprep.subr.mxu0 %v104_v9  ;;  %277 = vmatpush1.msra.mxu1 %v226_v19  ;;  %v94_v26 = vld [vmem:[#allocation5 + $0x68] sm:$0xff]  ;;  %v93_v28 = vld [vmem:[#allocation5 + $0x60] sm:$0xff]  ;;  %v221_v29 = vld [vmem:[#allocation7 + $0xb8] sm:$0xff] }
  0x3e   :  { %134 = vmatpush1.msra.mxu0 %v103_v10  ;;  %278 = vmatprep.subr.mxu1 %v225_v21  ;;  %v92_v30 = vld [vmem:[#allocation5 + $0x58] sm:$0xff]  ;;  %v220_v31 = vld [vmem:[#allocation7 + $0xb0] sm:$0xff]  ;;  %v219_v33 = vld [vmem:[#allocation7 + $0xa8] sm:$0xff] }
  0x3f   :  { %135 = vmatprep.subr.mxu0 %v102_v11  ;;  %279 = vmatpush1.msra.mxu1 %v224_v23  ;;  %v91_v32 = vld [vmem:[#allocation5 + $0x50] sm:$0xff]  ;;  %v90_v34 = vld [vmem:[#allocation5 + $0x48] sm:$0xff]  ;;  %v218_v35 = vld [vmem:[#allocation7 + $0xa0] sm:$0xff] }
  0x40   :  { %136 = vmatpush1.msra.mxu0 %v101_v12  ;;  %280 = vmatprep.subr.mxu1 %v223_v25  ;;  %v89_v36 = vld [vmem:[#allocation5 + $0x40] sm:$0xff]  ;;  %v217_v37 = vld [vmem:[#allocation7 + $0x98] sm:$0xff]  ;;  %v216_v39 = vld [vmem:[#allocation7 + $0x90] sm:$0xff] }
  0x41   :  { %137 = vmatprep.subr.mxu0 %v100_v13  ;;  %281 = vmatpush1.msra.mxu1 %v222_v27  ;;  %v88_v38 = vld [vmem:[#allocation5 + $0x38] sm:$0xff]  ;;  %v87_v40 = vld [vmem:[#allocation5 + $0x30] sm:$0xff]  ;;  %v215_v41 = vld [vmem:[#allocation7 + $0x88] sm:$0xff] }
  0x42   :  { %138 = vmatpush1.msra.mxu0 %v99_v14  ;;  %282 = vmatprep.subr.mxu1 %v221_v29  ;;  %v86_v42 = vld [vmem:[#allocation5 + $0x28] sm:$0xff]  ;;  %v214_v43 = vld [vmem:[#allocation7 + $0x80] sm:$0xff]  ;;  %v213_v45 = vld [vmem:[#allocation7 + $0x78] sm:$0xff] }
  0x43   :  { %139 = vmatprep.subr.mxu0 %v98_v18  ;;  %283 = vmatpush1.msra.mxu1 %v220_v31  ;;  %v85_v44 = vld [vmem:[#allocation5 + $0x20] sm:$0xff]  ;;  %v84_v46 = vld [vmem:[#allocation5 + $0x18] sm:$0xff]  ;;  %v212_v47 = vld [vmem:[#allocation7 + $0x70] sm:$0xff] }
  0x44   :  { %140 = vmatpush1.msra.mxu0 %v97_v20  ;;  %284 = vmatprep.subr.mxu1 %v219_v33  ;;  %v83_v48 = vld [vmem:[#allocation5 + $0x10] sm:$0xff]  ;;  %v211_v49 = vld [vmem:[#allocation7 + $0x68] sm:$0xff]  ;;  %v210_v51 = vld [vmem:[#allocation7 + $0x60] sm:$0xff] }
  0x45   :  { %141 = vmatprep.subr.mxu0 %v96_v22  ;;  %285 = vmatpush1.msra.mxu1 %v218_v35  ;;  %v82_v50 = vld [vmem:[#allocation5 + $0x8] sm:$0xff]  ;;  %v81_v52 = vld [vmem:[#allocation5] sm:$0xff]  ;;  %v209_v53 = vld [vmem:[#allocation7 + $0x58] sm:$0xff] }
  0x46   :  { %142 = vmatpush1.msra.mxu0 %v95_v24  ;;  %286 = vmatprep.subr.mxu1 %v217_v37  ;;  %v80_v54 = vld [vmem:[#allocation2] sm:$0xff]  ;;  %v208_v55 = vld [vmem:[#allocation7 + $0x50] sm:$0xff]  ;;  %v207_v56 = vld [vmem:[#allocation7 + $0x48] sm:$0xff] }
  0x47   :  { %143 = vmatprep.subr.mxu0 %v94_v26  ;;  %287 = vmatpush1.msra.mxu1 %v216_v39  ;;  %v206_v57 = vld [vmem:[#allocation7 + $0x40] sm:$0xff]  ;;  %v205_v58 = vld [vmem:[#allocation7 + $0x38] sm:$0xff]  ;;  %v204_v59 = vld [vmem:[#allocation7 + $0x30] sm:$0xff] }
  0x48   :  { %144 = vmatpush1.msra.mxu0 %v93_v28  ;;  %288 = vmatprep.subr.mxu1 %v215_v41  ;;  %v203_v60 = vld [vmem:[#allocation7 + $0x28] sm:$0xff]  ;;  %v202_v61 = vld [vmem:[#allocation7 + $0x20] sm:$0xff]  ;;  %v201_v62 = vld [vmem:[#allocation7 + $0x18] sm:$0xff] }
  0x49   :  { %145 = vmatprep.subr.mxu0 %v92_v30  ;;  %289 = vmatpush1.msra.mxu1 %v214_v43  ;;  %v200_v63 = vld [vmem:[#allocation7 + $0x10] sm:$0xff]  ;;  %v199_v0 = vld [vmem:[#allocation7 + $0x8] sm:$0xff]  ;;  %v198_v1 = vld [vmem:[#allocation7] sm:$0xff] }
  0x4a   :  { %146 = vmatpush1.msra.mxu0 %v91_v32  ;;  %290 = vmatprep.subr.mxu1 %v213_v45  ;;  %v261_v2 = vld [vmem:[#allocation7 + $0x1f8] sm:$0xff]  ;;  %v260_v3 = vld [vmem:[#allocation7 + $0x1f0] sm:$0xff]  ;;  %v259_v4 = vld [vmem:[#allocation7 + $0x1e8] sm:$0xff] }
  0x4b   :  { %147 = vmatprep.subr.mxu0 %v90_v34  ;;  %291 = vmatpush1.msra.mxu1 %v212_v47  ;;  %v258_v5 = vld [vmem:[#allocation7 + $0x1e0] sm:$0xff]  ;;  %v257_v6 = vld [vmem:[#allocation7 + $0x1d8] sm:$0xff]  ;;  %v256_v7 = vld [vmem:[#allocation7 + $0x1d0] sm:$0xff] }
  0x4c   :  { %148 = vmatpush1.msra.mxu0 %v89_v36  ;;  %292 = vmatprep.subr.mxu1 %v211_v49  ;;  %v255_v8 = vld [vmem:[#allocation7 + $0x1c8] sm:$0xff]  ;;  %v254_v9 = vld [vmem:[#allocation7 + $0x1c0] sm:$0xff]  ;;  %v253_v10 = vld [vmem:[#allocation7 + $0x1b8] sm:$0xff] }
  0x4d   :  { %149 = vmatprep.subr.mxu0 %v88_v38  ;;  %293 = vmatpush1.msra.mxu1 %v210_v51  ;;  %v252_v11 = vld [vmem:[#allocation7 + $0x1b0] sm:$0xff]  ;;  %v251_v12 = vld [vmem:[#allocation7 + $0x1a8] sm:$0xff]  ;;  %v250_v13 = vld [vmem:[#allocation7 + $0x1a0] sm:$0xff] }
  0x4e   :  { %150 = vmatpush1.msra.mxu0 %v87_v40  ;;  %294 = vmatprep.subr.mxu1 %v209_v53  ;;  %v249_v14 = vld [vmem:[#allocation7 + $0x198] sm:$0xff]  ;;  %v248_v15 = vld [vmem:[#allocation7 + $0x190] sm:$0xff]  ;;  %v247_v16 = vld [vmem:[#allocation7 + $0x188] sm:$0xff] }
  0x4f   :  { %151 = vmatprep.subr.mxu0 %v86_v42  ;;  %295 = vmatpush1.msra.mxu1 %v208_v55  ;;  %v246_v17 = vld [vmem:[#allocation7 + $0x180] sm:$0xff]  ;;  %v245_v18 = vld [vmem:[#allocation7 + $0x178] sm:$0xff]  ;;  %v244_v19 = vld [vmem:[#allocation7 + $0x170] sm:$0xff] }
  0x50   :  { %152 = vmatpush1.msra.mxu0 %v85_v44  ;;  %296 = vmatprep.subr.mxu1 %v207_v56  ;;  %v243_v20 = vld [vmem:[#allocation7 + $0x168] sm:$0xff]  ;;  %v242_v21 = vld [vmem:[#allocation7 + $0x160] sm:$0xff]  ;;  %v241_v22 = vld [vmem:[#allocation7 + $0x158] sm:$0xff] }
  0x51   :  { %153 = vmatprep.subr.mxu0 %v84_v46  ;;  %297 = vmatpush1.msra.mxu1 %v206_v57  ;;  %v240_v23 = vld [vmem:[#allocation7 + $0x150] sm:$0xff]  ;;  %v239_v24 = vld [vmem:[#allocation7 + $0x148] sm:$0xff]  ;;  %v238_v25 = vld [vmem:[#allocation7 + $0x140] sm:$0xff] }
  0x52   :  { %154 = vmatpush1.msra.mxu0 %v83_v48  ;;  %298 = vmatprep.subr.mxu1 %v205_v58  ;;  %v237_v26 = vld [vmem:[#allocation7 + $0x138] sm:$0xff]  ;;  %v236_v27 = vld [vmem:[#allocation7 + $0x130] sm:$0xff]  ;;  %v235_v28 = vld [vmem:[#allocation7 + $0x128] sm:$0xff]  ;;  %v115_v58 = vlaneseq }
  0x53   :  { %155 = vmatprep.subr.mxu0 %v82_v50  ;;  %299 = vmatpush1.msra.mxu1 %v204_v59  ;;  %v234_v29 = vld [vmem:[#allocation7 + $0x120] sm:$0xff]  ;;  %v233_v30 = vld [vmem:[#allocation7 + $0x118] sm:$0xff]  ;;  %v232_v31 = vld [vmem:[#allocation7 + $0x110] sm:$0xff] }
  0x54   :  { %156 = vmatpush1.msra.mxu0 %v81_v52  ;;  %300 = vmatprep.subr.mxu1 %v203_v60  ;;  %v231_v32 = vld [vmem:[#allocation7 + $0x108] sm:$0xff]  ;;  %v230_v33 = vld [vmem:[#allocation7 + $0x100] sm:$0xff]  ;;  %v378_v34 = vld [vmem:[#allocation8 + $0xf8] sm:$0xff]  ;;  %v116_v59 = vshrl.u32 %v115_v58, 7 }
  0x55   :  { %190 = vmatmul.mubr.f32.vlgmr.msra.gmra.mxu0 %v80_v54  ;;  %301 = vmatpush1.msra.mxu1 %v202_v61  ;;  %v362_v35 = vld [vmem:[#allocation8 + $0x78] sm:$0xff]  ;;  %v377_v36 = vld [vmem:[#allocation8 + $0xf0] sm:$0xff]  ;;  %v376_v38 = vld [vmem:[#allocation8 + $0xe8] sm:$0xff] }
  0x56   :  { %302 = vmatprep.subr.mxu1 %v201_v62  ;;  %475 = vmatprep.subr.mxu0 %v378_v34  ;;  %v361_v37 = vld [vmem:[#allocation8 + $0x70] sm:$0xff]  ;;  %v360_v39 = vld [vmem:[#allocation8 + $0x68] sm:$0xff]  ;;  %v375_v40 = vld [vmem:[#allocation8 + $0xe0] sm:$0xff]  ;;  %v117_v60 = vsub.s32 0, %v116_v59  ;;  %v121_v62 = vsub.s32 1, %v116_v59 }
  0x57   :  { %303 = vmatpush1.msra.mxu1 %v200_v63  ;;  %476 = vmatpush3.msra.mxu0 %v362_v35  ;;  %v359_v41 = vld [vmem:[#allocation8 + $0x60] sm:$0xff]  ;;  %v374_v42 = vld [vmem:[#allocation8 + $0xd8] sm:$0xff]  ;;  %v373_v44 = vld [vmem:[#allocation8 + $0xd0] sm:$0xff] }
  0x58   :  { %304 = vmatprep.subr.mxu1 %v199_v0  ;;  %477 = vmatprep.subr.mxu0 %v377_v36  ;;  %v358_v43 = vld [vmem:[#allocation8 + $0x58] sm:$0xff]  ;;  %v357_v45 = vld [vmem:[#allocation8 + $0x50] sm:$0xff]  ;;  %v372_v46 = vld [vmem:[#allocation8 + $0xc8] sm:$0xff] }
  0x59   :  { %305 = vmatpush1.msra.mxu1 %v198_v1  ;;  %478 = vmatpush3.msra.mxu0 %v361_v37  ;;  %v356_v47 = vld [vmem:[#allocation8 + $0x48] sm:$0xff]  ;;  %v371_v48 = vld [vmem:[#allocation8 + $0xc0] sm:$0xff]  ;;  %v370_v50 = vld [vmem:[#allocation8 + $0xb8] sm:$0xff] }
  0x5a   :  { %306 = vmatprep.subr.mxu1 %v261_v2  ;;  %479 = vmatprep.subr.mxu0 %v376_v38  ;;  %v355_v49 = vld [vmem:[#allocation8 + $0x40] sm:$0xff]  ;;  %v354_v51 = vld [vmem:[#allocation8 + $0x38] sm:$0xff]  ;;  %v369_v52 = vld [vmem:[#allocation8 + $0xb0] sm:$0xff] }
  0x5b   :  { %307 = vmatpush2.msra.mxu1 %v260_v3  ;;  %480 = vmatpush3.msra.mxu0 %v360_v39  ;;  %v353_v53 = vld [vmem:[#allocation8 + $0x30] sm:$0xff]  ;;  %v368_v54 = vld [vmem:[#allocation8 + $0xa8] sm:$0xff]  ;;  %v367_v56 = vld [vmem:[#allocation8 + $0xa0] sm:$0xff] }
  0x5c   :  { %308 = vmatprep.subr.mxu1 %v259_v4  ;;  %481 = vmatprep.subr.mxu0 %v375_v40  ;;  %v352_v55 = vld [vmem:[#allocation8 + $0x28] sm:$0xff]  ;;  %v351_v57 = vld [vmem:[#allocation8 + $0x20] sm:$0xff]  ;;  %v113_v61 = vld [vmem:[%s704_s2] sm:$0x3] }
  0x5d   :  { %309 = vmatpush2.msra.mxu1 %v258_v5  ;;  %482 = vmatpush3.msra.mxu0 %v359_v41  ;;  %v118_v63 = vrot.slane %v113_v61, %v117_v60  ;;  %v122_v0 = vrot.slane %v113_v61, %v121_v62 }
  0x5e   :  { %310 = vmatprep.subr.mxu1 %v257_v6  ;;  %483 = vmatprep.subr.mxu0 %v374_v42 }
  0x5f   :  { %311 = vmatpush2.msra.mxu1 %v256_v7  ;;  %484 = vmatpush3.msra.mxu0 %v358_v43  ;;  %v366_v7 = vld [vmem:[#allocation8 + $0x98] sm:$0xff] }
  0x60   :  { %312 = vmatprep.subr.mxu1 %v255_v8  ;;  %485 = vmatprep.subr.mxu0 %v373_v44  ;;  %v350_v8 = vld [vmem:[#allocation8 + $0x18] sm:$0xff] }
  0x61   :  { %313 = vmatpush2.msra.mxu1 %v254_v9  ;;  %486 = vmatpush3.msra.mxu0 %v357_v45  ;;  %v365_v9 = vld [vmem:[#allocation8 + $0x90] sm:$0xff] }
  0x62   :  { %314 = vmatprep.subr.mxu1 %v253_v10  ;;  %487 = vmatprep.subr.mxu0 %v372_v46  ;;  %v349_v10 = vld [vmem:[#allocation8 + $0x10] sm:$0xff] }
  0x63   :  { %315 = vmatpush2.msra.mxu1 %v252_v11  ;;  %488 = vmatpush3.msra.mxu0 %v356_v47  ;;  %v364_v11 = vld [vmem:[#allocation8 + $0x88] sm:$0xff] }
  0x64   :  { %316 = vmatprep.subr.mxu1 %v251_v12  ;;  %489 = vmatprep.subr.mxu0 %v371_v48  ;;  %v348_v12 = vld [vmem:[#allocation8 + $0x8] sm:$0xff] }
  0x65   :  { %317 = vmatpush2.msra.mxu1 %v250_v13  ;;  %490 = vmatpush3.msra.mxu0 %v355_v49  ;;  %v363_v13 = vld [vmem:[#allocation8 + $0x80] sm:$0xff] }
  0x66   :  { %318 = vmatprep.subr.mxu1 %v249_v14  ;;  %491 = vmatprep.subr.mxu0 %v370_v50  ;;  %v347_v14 = vld [vmem:[#allocation8] sm:$0xff] }
  0x67   :  { %319 = vmatpush2.msra.mxu1 %v248_v15  ;;  %492 = vmatpush3.msra.mxu0 %v354_v51  ;;  %v262_v15 = vld [vmem:[%s706_s4] sm:$0x3]  ;;  %s600_s4 = scalar_lea.vmem %s464_s27, 128 }
  0x68   :  { %320 = vmatprep.subr.mxu1 %v247_v16  ;;  %493 = vmatprep.subr.mxu0 %v369_v52  ;;  %v267_v16 = vrot.slane %v262_v15, %v117_v60  ;;  %p601_p6 = scmp.ne.s32.totalorder %s464_s27, %s600_s4  ;;  %p606_p8 = scmp.lt.s32.totalorder %s600_s4, %s600_s4 }
  0x69   :  { %321 = vmatpush2.msra.mxu1 %v246_v17  ;;  %494 = vmatpush3.msra.mxu0 %v353_v53  ;;  %v271_v17 = vrot.slane %v262_v15, %v121_v62 }
  0x6a   :  { %322 = vmatprep.subr.mxu1 %v245_v18  ;;  %495 = vmatprep.subr.mxu0 %v368_v54  ;;  %p607_p9 = por %p606_p8, %p605_p7 }
  0x6b   :  { %323 = vmatpush2.msra.mxu1 %v244_v19  ;;  %496 = vmatpush3.msra.mxu0 %v352_v55 }
  0x6c   :  { %324 = vmatprep.subr.mxu1 %v243_v20  ;;  %497 = vmatprep.subr.mxu0 %v367_v56  ;;  %p608_p10 = pnand %p607_p9, %p601_p6 }
  0x6d   :  { %325 = vmatpush2.msra.mxu1 %v242_v21  ;;  %498 = vmatpush3.msra.mxu0 %v351_v57 }
  0x6e   :  { %326 = vmatprep.subr.mxu1 %v241_v22  ;;  %499 = vmatprep.subr.mxu0 %v366_v7 }
  0x6f   :  { %327 = vmatpush2.msra.mxu1 %v240_v23  ;;  %500 = vmatpush3.msra.mxu0 %v350_v8 }
  0x70   :  { %328 = vmatprep.subr.mxu1 %v239_v24  ;;  %501 = vmatprep.subr.mxu0 %v365_v9 }
  0x71   :  { %329 = vmatpush2.msra.mxu1 %v238_v25  ;;  %502 = vmatpush3.msra.mxu0 %v349_v10  ;;  %v474_v25 = vld [vmem:[%s708_s6] ss:$0 sm:$0xff] }
  0x72   :  { %330 = vmatprep.subr.mxu1 %v237_v26  ;;  %503 = vmatprep.subr.mxu0 %v364_v11 }
  0x73   :  { %331 = vmatpush2.msra.mxu1 %v236_v27  ;;  %504 = vmatpush3.msra.mxu0 %v348_v12 }
  0x74   :  { %332 = vmatprep.subr.mxu1 %v235_v28  ;;  %505 = vmatprep.subr.mxu0 %v363_v13 }
  0x75   :  { %333 = vmatpush2.msra.mxu1 %v234_v29  ;;  %506 = vmatpush3.msra.mxu0 %v347_v14 }
  0x76   :  { %334 = vmatprep.subr.mxu1 %v233_v30 }
  0x77   :  { %335 = vmatpush2.msra.mxu1 %v232_v31 }
  0x78   :  { %336 = vmatprep.subr.mxu1 %v231_v32 }
  0x79   :  { %337 = vmatpush2.msra.mxu1 %v230_v33 }
 0x115   :  { %v191_v1 = vpop.f32.mrf.mxu0 }
 0x116   :  { %v192_v2 = vadd.f32 %v191_v1, %v118_v63 }
 0x117   :  { %v193_v3 = vpop.f32.mrf.mxu0 }
 0x118   :  { %v194_v4 = vadd.f32 %v193_v3, %v122_v0  ;;  %v196_v6 = vmax.f32 %v192_v2, 0.0 }
 0x11a   :  { %v197_v5 = vmax.f32 %v194_v4, 0.0 }
 0x11c   :  { %338 = vmatprep.mubr.f32.mxu1 %v197_v5 }
 0x11d   :  { %339 = vmatmul.mubr.f32.vlgmr.msra.gmra.mxu1 %v196_v6 }
 0x1dd   :  { %v340_v18 = vpop.f32.mrf.mxu1 }
 0x1de   :  { %v341_v19 = vadd.f32 %v340_v18, %v267_v16 }
 0x1df   :  { %v342_v20 = vpop.f32.mrf.mxu1 }
 0x1e0   :  { %v343_v21 = vadd.f32 %v342_v20, %v271_v17  ;;  %v345_v23 = vmax.f32 %v341_v19, 0.0 }
 0x1e2   :  { %v346_v22 = vmax.f32 %v343_v21, 0.0 }
 0x1e4   :  { %450 = vmatprep.mubr.f32.mxu0 %v346_v22 }
 0x1e5   :  { %451 = vmatmul.mubr.f32.vlgmr.msra.gmra.mxu0 %v345_v23 }
 0x2a5   :  { %v507_v24 = vpop.f32.mrf.mxu0 }
 0x2a7   :  { %v508_v26 = vpop.f32.mrf.mxu0 }
 0x2a8   :  { %v509_v27 = vadd.f32 %v508_v26, %v507_v24 }
 0x2aa   :  { %v453_v28 = vadd.f32 %v509_v27, %v474_v25 }
 0x2ac   :  { %456 = vst [vmem:[#allocation10] sm:$0xff] %v453_v28 }
 0x2ad   :  { %611 = shalt.err (!%p608_p10)
}
 0x2ae   :  { %466 = dma.vmem_to_hbm [thread:$0]  %s464_s27, 128, %s709_s7, [#allocation4]  }
 0x2af   :  { %626 = dma.done.wait [#allocation4], 128  }
 0x2b0   :  { %627 = vsyncadd [#allocation4], 4294967168 }
 0x2b1   :  { %470 = vsyncpa [#allocation3], 1 }
 0x2b2   :  { %471 = vsyncpa [#allocation6], 1 }
 0x2b3   :  { %472 = vsyncpa [#allocation9], 1 }
 0x2b4   :  { %473 = vsyncpa [#allocation4], 1 }

</bundles_post_ra>
